<compile_context>
chip_gen: v5e
topology: v5e:2x2
jax: 0.10.0
libtpu: 0.0.40
codegen_flags: <defaults>
</compile_context>

<pallas_src>
import functools

import jax
import jax.numpy as jnp
from jax.experimental import pallas as pl
from jax.experimental.pallas import tpu as pltpu


_PAD_MODES = ("constant", "reflect", "replicate", "circular")
_PAD_MODE_TO_JNP = {
    "constant": "constant",
    "reflect": "reflect",
    "replicate": "edge",
    "circular": "wrap",
}


# ----------------------------------------------------------------------------
# Gaussian kernel construction (mirror of kornia/padertorch `gaussian`,
# `get_gaussian_kernel1d/2d`, vectorized over a per-batch sigma).
# ----------------------------------------------------------------------------
def gaussian_kernel1d(kernel_size, sigma):
    """Per-batch 1-D Gaussian window. sigma: (B,) -> (B, kernel_size), rows sum to 1."""
    sigma = jnp.asarray(sigma, jnp.float32).reshape(-1)
    x = jnp.arange(kernel_size, dtype=jnp.float32) - kernel_size // 2
    if kernel_size % 2 == 0:
        x = x + 0.5
    g = jnp.exp(-(x[None, :] ** 2) / (2.0 * sigma[:, None] ** 2))
    return g / jnp.sum(g, axis=-1, keepdims=True)


def gaussian_kernel2d(kernel_size, sigma):
    """Per-batch 2-D Gaussian kernel. sigma: (B,) -> (B, k, k). (reference only)"""
    k1 = gaussian_kernel1d(kernel_size, sigma)
    return k1[:, :, None] * k1[:, None, :]


# ----------------------------------------------------------------------------
# In-kernel halo construction: pad a 4-D tile (value or Ref) along one axis.
# ----------------------------------------------------------------------------
def _padded_along(x, axis, n, pf, pe, mode):
    """Return x padded by (pf, pe) along `axis` (original length n) per `mode`.

    `x` may be a VMEM Ref or an array value; only the rows/columns actually
    needed are sliced. pf/pe are small static ints, so the halo is a cheap
    concatenation of a few 1-wide slices.
    """
    def sl(lo, hi):
        idx = [slice(None)] * 4
        idx[axis] = slice(lo, hi)
        return x[tuple(idx)]

    mid = sl(0, n)
    front, back = [], []
    if mode == "reflect":
        front = [sl(pf - i, pf - i + 1) for i in range(pf)]
        back = [sl(n - 2 - i, n - 1 - i) for i in range(pe)]
    elif mode == "replicate":
        front = [sl(0, 1)] * pf
        back = [sl(n - 1, n)] * pe
    elif mode == "circular":
        front = [sl(n - pf, n)] if pf else []
        back = [sl(0, pe)] if pe else []
    elif mode == "constant":
        if pf:
            zshape = list(mid.shape)
            zshape[axis] = pf
            front = [jnp.zeros(zshape, mid.dtype)]
        if pe:
            zshape = list(mid.shape)
            zshape[axis] = pe
            back = [jnp.zeros(zshape, mid.dtype)]
    else:
        raise ValueError(f"unsupported pad mode {mode!r}")

    parts = front + [mid] + back
    if len(parts) == 1:
        return mid
    return jnp.concatenate(parts, axis=axis)


# ----------------------------------------------------------------------------
# Pallas kernel: separable per-batch Gaussian blur of one channel tile.
# ----------------------------------------------------------------------------
def _blur_kernel(w_ref, x_ref, o_ref, *, k, pf, pe, out_h, out_w, pad_mode):
    """Separable blur of one (1, ct, H, W) tile with per-batch 1-D taps.

    w_ref : (B*k,) f32 SMEM    -- 1-D Gaussian taps, batch b at [b*k : (b+1)*k]
    x_ref : (1, ct, H, W) VMEM -- unpadded input tile
    o_ref : (1, ct, H, W) VMEM -- blurred output tile
    """
    base = pl.program_id(0) * k
    wt = [w_ref[base + i] for i in range(k)]  # scalar taps for this batch element

    # ---- vertical (H) pass: halo along sublanes, k shifted-slice MACs in f32.
    xpad = _padded_along(x_ref, axis=2, n=out_h, pf=pf, pe=pe, mode=pad_mode)
    acc = wt[0] * xpad[:, :, 0:out_h, :].astype(jnp.float32)
    for dy in range(1, k):
        acc = acc + wt[dy] * xpad[:, :, dy:dy + out_h, :].astype(jnp.float32)

    # ---- horizontal (W) pass: halo along lanes on the f32 intermediate.
    # (Padding in W commutes with the vertical blur for every pad mode.)
    tpad = _padded_along(acc, axis=3, n=out_w, pf=pf, pe=pe, mode=pad_mode)
    out = wt[0] * tpad[:, :, :, 0:out_w]
    for dx in range(1, k):
        out = out + wt[dx] * tpad[:, :, :, dx:dx + out_w]

    o_ref[...] = out.astype(o_ref.dtype)


def _pick_channel_tile(b, c, h, w, k, itemsize, vmem_cap):
    """Largest channel-tile divisor of `c` whose per-step VMEM fits the chip."""
    hp, wp = h + k - 1, w + k - 1
    # Per-channel per-grid-step VMEM: double-buffered in+out blocks plus the
    # in-kernel padded input copy and f32 intermediates.
    per_ch = (4 * h * w * itemsize            # 2 x (in + out) double buffers
              + hp * w * itemsize             # H-padded input copy (input dtype)
              + (2 * h * w + h * wp) * 4)     # f32 accumulators + W-padded intermediate
    budget = int(vmem_cap * 0.45)
    ct = max(1, min(c, budget // per_ch))
    while c % ct:
        ct -= 1
    # v7x megacore: keep >= 2 'parallel' grid points when possible so both
    # TensorCores get work.  (No effect on single-TC v5e/v6e.)
    if b * (c // ct) < 2 and c > 1:
        d = next(d for d in range(2, c + 1) if c % d == 0)
        ct = c // d
    return int(ct)


@functools.partial(jax.jit, static_argnames=("kernel_size", "pad_mode", "training"))
def gaussian_blur2d(x, sigma, kernel_size, pad_mode="reflect", training=True):
    """Forward pass of GaussianBlur2d. x: (B, C, H, W); sigma: (B,) float."""
    if x.ndim != 4:
        raise ValueError(f"Invalid input shape, we expect BxCxHxW. Got: {x.shape}")
    if pad_mode not in _PAD_MODES:
        raise ValueError(f"pad_mode must be one of {_PAD_MODES}, got {pad_mode!r}")
    if not training:
        return x

    B, C, H, W = x.shape
    k = int(kernel_size)
    size = k - 1
    pf, pe = size // 2, size - size // 2

    if pad_mode == "reflect" and max(pf, pe) > min(H, W) - 1:
        raise ValueError(
            f"reflect padding of width {max(pf, pe)} needs min(H, W) > {max(pf, pe)}; "
            f"got H={H}, W={W}")

    # One sigma per batch element (sigma_sampling_fn(B) in the module). A wrong
    # length would silently read out-of-bounds SMEM on TPU, so check here.
    sigma = jnp.asarray(sigma, jnp.float32).reshape(-1)
    if sigma.shape[0] == 1 and B > 1:
        sigma = jnp.broadcast_to(sigma, (B,))
    if sigma.shape[0] != B:
        raise ValueError(
            f"sigma must provide one value per batch element ({B}), got {sigma.shape[0]}")

    # Per-batch 1-D Gaussian taps, flattened to 1-D so SMEM is not padded to
    # 128-word rows per batch element.
    w_flat = gaussian_kernel1d(k, sigma).reshape(B * k).astype(jnp.float32)

    # Generation-aware tile / VMEM budget (128 MiB on v5e/v6e, 64 MiB on v7x).
    try:
        vmem_cap = int(pltpu.get_tpu_info().vmem_capacity_bytes)
    except Exception:
        vmem_cap = 64 << 20  # conservative default that fits every generation

    ct = _pick_channel_tile(B, C, H, W, k, x.dtype.itemsize, vmem_cap)

    Hp, Wp = H + size, W + size
    per_step = ct * (4 * H * W * x.dtype.itemsize
                     + Hp * W * x.dtype.itemsize
                     + (2 * H * W + H * Wp) * 4)
    vmem_limit = int(min(vmem_cap, max(32 << 20, per_step + (8 << 20))))

    # TODO(synk): add an H-blocked path (halo rows fetched via manual
    # make_async_copy) for single-channel planes too large for VMEM even at ct=1.

    return pl.pallas_call(
        functools.partial(
            _blur_kernel, k=k, pf=pf, pe=pe, out_h=H, out_w=W, pad_mode=pad_mode),
        out_shape=jax.ShapeDtypeStruct((B, C, H, W), x.dtype),
        grid=(B, C // ct),
        in_specs=[
            pl.BlockSpec(memory_space=pltpu.MemorySpace.SMEM),          # 1-D taps
            pl.BlockSpec((1, ct, H, W), lambda b, c: (b, c, 0, 0)),      # unpadded input tile
        ],
        out_specs=pl.BlockSpec((1, ct, H, W), lambda b, c: (b, c, 0, 0)),
        compiler_params=pltpu.CompilerParams(
            dimension_semantics=("parallel", "parallel"),
            vmem_limit_bytes=vmem_limit,
        ),
    )(w_flat, x)


# ----------------------------------------------------------------------------
# Pure-JAX reference (same math, no Pallas) for correctness checking.
# ----------------------------------------------------------------------------
def gaussian_blur2d_ref(x, sigma, kernel_size, pad_mode="reflect"):
    k = int(kernel_size)
    size = k - 1
    pf, pe = size // 2, size - size // 2
    xp = jnp.pad(
        x.astype(jnp.float32),
        ((0, 0), (0, 0), (pf, pe), (pf, pe)),
        mode=_PAD_MODE_TO_JNP[pad_mode],
    )
    w = gaussian_kernel2d(k, sigma)                       # (B, k, k)
    B, C, H, W = x.shape
    out = jnp.zeros((B, C, H, W), jnp.float32)
    for dy in range(k):
        for dx in range(k):
            out = out + w[:, dy, dx][:, None, None, None] * xp[:, :, dy:dy + H, dx:dx + W]
    return out.astype(x.dtype)


if __name__ == "__main__":
    key = jax.random.PRNGKey(0)
    kx, ks = jax.random.split(key)

    # ---- main demo: B=2, C=4, H=W=16, kernel_size=3, random per-batch sigma ----
    B, C, H, W = 2, 4, 16, 16
    kernel_size = 3
    x = jax.random.normal(kx, (B, C, H, W), dtype=jnp.float32)
    # sigma_sampling_fn stand-in (module uses a host numpy sampler): one sigma
    # per batch element, uniform in [0.5, 2.0).
    sigma = jax.random.uniform(ks, (B,), jnp.float32, 0.5, 2.0)

    out = jax.block_until_ready(gaussian_blur2d(x, sigma, kernel_size, "reflect", True))
    ref = gaussian_blur2d_ref(x, sigma, kernel_size, "reflect")
    assert out.shape == x.shape and out.dtype == x.dtype
    assert jnp.allclose(out, ref, atol=1e-5), "mismatch vs JAX reference (reflect, k=3)"

    # Other pad modes exercise the in-kernel halo variants.
    for mode in ("replicate", "circular", "constant"):
        o_m = jax.block_until_ready(gaussian_blur2d(x, sigma, kernel_size, mode, True))
        r_m = gaussian_blur2d_ref(x, sigma, kernel_size, mode)
        assert jnp.allclose(o_m, r_m, atol=1e-5), f"mismatch vs JAX reference ({mode})"

    # Larger kernel (multi-row/column halo path).
    out5 = jax.block_until_ready(gaussian_blur2d(x, sigma, 5, "reflect", True))
    ref5 = gaussian_blur2d_ref(x, sigma, 5, "reflect")
    assert jnp.allclose(out5, ref5, atol=1e-5), "mismatch vs JAX reference (reflect, k=5)"

    # Eval mode is identity.
    out_eval = jax.block_until_ready(gaussian_blur2d(x, sigma, kernel_size, "reflect", False))
    assert jnp.array_equal(out_eval, x)

    # ---- module doctest: delta input, sigmas (0.5, 1.0, 2.0), kernel_size=3 ----
    xd = jnp.zeros((3, 1, 5, 5), jnp.float32).at[:, :, 2, 2].set(1.0)
    sig_d = jnp.array([0.5, 1.0, 2.0], jnp.float32)
    out_d = jax.block_until_ready(gaussian_blur2d(xd, sig_d, 3, "reflect", True))
    expected_b0 = jnp.array([[0.0113, 0.0838, 0.0113],
                             [0.0838, 0.6193, 0.0838],
                             [0.0113, 0.0838, 0.0113]], jnp.float32)
    expected_b2 = jnp.array([[0.1019, 0.1154, 0.1019],
                             [0.1154, 0.1308, 0.1154],
                             [0.1019, 0.1154, 0.1019]], jnp.float32)
    assert jnp.allclose(out_d[0, 0, 1:4, 1:4], expected_b0, atol=1e-3)
    assert jnp.allclose(out_d[2, 0, 1:4, 1:4], expected_b2, atol=1e-3)
    assert jnp.allclose(out_d[:, :, 0, :], 0.0, atol=1e-6)   # border stays ~0

    print("KERNEL_OK")
</pallas_src>

<mosaic_0001>
module attributes {stable_mosaic.version = 11 : i64} {
  func.func @_blur_kernel(%arg0: i32, %arg1: i32, %arg2: memref<6xf32, #tpu.memory_space<smem>>, %arg3: memref<1x4x16x16xf32, #tpu.memory_space<vmem>>, %arg4: memref<1x4x16x16xf32, #tpu.memory_space<vmem>>) attributes {dimension_semantics = [#tpu.dimension_semantics<parallel>, #tpu.dimension_semantics<parallel>], iteration_bounds = array<i64: 2, 1>, scalar_prefetch = 0 : i64, scratch_operands = 0 : i64, tpu.core_type = #tpu.core_type<tc>, window_params = [{transform_indices = @transform_0, window_bounds = array<i64: 6>}, {transform_indices = @transform_1, window_bounds = array<i64: 1, 4, 16, 16>}, {transform_indices = @transform_2, window_bounds = array<i64: 1, 4, 16, 16>}]} {
    %c3_i32 = arith.constant 3 : i32
    %0 = arith.muli %arg0, %c3_i32 : i32
    %c0_i32 = arith.constant 0 : i32
    %1 = arith.addi %0, %c0_i32 : i32
    %2 = arith.index_cast %1 : i32 to index
    %3 = memref.load %arg2[%2] : memref<6xf32, #tpu.memory_space<smem>>
    %c1_i32 = arith.constant 1 : i32
    %4 = arith.addi %0, %c1_i32 : i32
    %5 = arith.index_cast %4 : i32 to index
    %6 = memref.load %arg2[%5] : memref<6xf32, #tpu.memory_space<smem>>
    %c2_i32 = arith.constant 2 : i32
    %7 = arith.addi %0, %c2_i32 : i32
    %8 = arith.index_cast %7 : i32 to index
    %9 = memref.load %arg2[%8] : memref<6xf32, #tpu.memory_space<smem>>
    %c0 = arith.constant 0 : index
    %c0_0 = arith.constant 0 : index
    %c0_1 = arith.constant 0 : index
    %c0_2 = arith.constant 0 : index
    %10 = vector.load %arg3[%c0, %c0_0, %c0_1, %c0_2] : memref<1x4x16x16xf32, #tpu.memory_space<vmem>>, vector<1x4x16x16xf32>
    %c0_3 = arith.constant 0 : index
    %c0_4 = arith.constant 0 : index
    %c1 = arith.constant 1 : index
    %c0_5 = arith.constant 0 : index
    %11 = vector.load %arg3[%c0_3, %c0_4, %c1, %c0_5] : memref<1x4x16x16xf32, #tpu.memory_space<vmem>>, vector<1x4x1x16xf32>
    %c0_6 = arith.constant 0 : index
    %c0_7 = arith.constant 0 : index
    %c14 = arith.constant 14 : index
    %c0_8 = arith.constant 0 : index
    %12 = vector.load %arg3[%c0_6, %c0_7, %c14, %c0_8] : memref<1x4x16x16xf32, #tpu.memory_space<vmem>>, vector<1x4x1x16xf32>
    %13 = tpu.concatenate %11, %10, %12 in 2 : vector<1x4x1x16xf32>, vector<1x4x16x16xf32>, vector<1x4x1x16xf32> -> vector<1x4x18x16xf32>
    %14 = vector.extract_strided_slice %13 {offsets = [0, 0, 0, 0], sizes = [1, 4, 16, 16], strides = [1, 1, 1, 1]} : vector<1x4x18x16xf32> to vector<1x4x16x16xf32>
    %15 = vector.broadcast %3 : f32 to vector<1x4x16x16xf32>
    %16 = arith.mulf %15, %14 : vector<1x4x16x16xf32>
    %17 = vector.extract_strided_slice %13 {offsets = [0, 0, 1, 0], sizes = [1, 4, 16, 16], strides = [1, 1, 1, 1]} : vector<1x4x18x16xf32> to vector<1x4x16x16xf32>
    %18 = vector.broadcast %6 : f32 to vector<1x4x16x16xf32>
    %19 = arith.mulf %18, %17 : vector<1x4x16x16xf32>
    %20 = arith.addf %16, %19 : vector<1x4x16x16xf32>
    %21 = vector.extract_strided_slice %13 {offsets = [0, 0, 2, 0], sizes = [1, 4, 16, 16], strides = [1, 1, 1, 1]} : vector<1x4x18x16xf32> to vector<1x4x16x16xf32>
    %22 = vector.broadcast %9 : f32 to vector<1x4x16x16xf32>
    %23 = arith.mulf %22, %21 : vector<1x4x16x16xf32>
    %24 = arith.addf %20, %23 : vector<1x4x16x16xf32>
    %25 = vector.extract_strided_slice %24 {offsets = [0, 0, 0, 1], sizes = [1, 4, 16, 1], strides = [1, 1, 1, 1]} : vector<1x4x16x16xf32> to vector<1x4x16x1xf32>
    %26 = vector.extract_strided_slice %24 {offsets = [0, 0, 0, 14], sizes = [1, 4, 16, 1], strides = [1, 1, 1, 1]} : vector<1x4x16x16xf32> to vector<1x4x16x1xf32>
    %27 = tpu.concatenate %25, %24, %26 in 3 : vector<1x4x16x1xf32>, vector<1x4x16x16xf32>, vector<1x4x16x1xf32> -> vector<1x4x16x18xf32>
    %28 = vector.extract_strided_slice %27 {offsets = [0, 0, 0, 0], sizes = [1, 4, 16, 16], strides = [1, 1, 1, 1]} : vector<1x4x16x18xf32> to vector<1x4x16x16xf32>
    %29 = vector.broadcast %3 : f32 to vector<1x4x16x16xf32>
    %30 = arith.mulf %29, %28 : vector<1x4x16x16xf32>
    %31 = vector.extract_strided_slice %27 {offsets = [0, 0, 0, 1], sizes = [1, 4, 16, 16], strides = [1, 1, 1, 1]} : vector<1x4x16x18xf32> to vector<1x4x16x16xf32>
    %32 = vector.broadcast %6 : f32 to vector<1x4x16x16xf32>
    %33 = arith.mulf %32, %31 : vector<1x4x16x16xf32>
    %34 = arith.addf %30, %33 : vector<1x4x16x16xf32>
    %35 = vector.extract_strided_slice %27 {offsets = [0, 0, 0, 2], sizes = [1, 4, 16, 16], strides = [1, 1, 1, 1]} : vector<1x4x16x18xf32> to vector<1x4x16x16xf32>
    %36 = vector.broadcast %9 : f32 to vector<1x4x16x16xf32>
    %37 = arith.mulf %36, %35 : vector<1x4x16x16xf32>
    %38 = arith.addf %34, %37 : vector<1x4x16x16xf32>
    %c0_9 = arith.constant 0 : index
    %c0_10 = arith.constant 0 : index
    %c0_11 = arith.constant 0 : index
    %c0_12 = arith.constant 0 : index
    %39 = vector.load %arg4[%c0_9, %c0_10, %c0_11, %c0_12] : memref<1x4x16x16xf32, #tpu.memory_space<vmem>>, vector<1x4x16x16xf32>
    tpu.vector_store %arg4[%c0_9, %c0_10, %c0_11, %c0_12], %38 {strides = array<i32>} : memref<1x4x16x16xf32, #tpu.memory_space<vmem>>, vector<1x4x16x16xf32>,
    return
  }
  func.func @transform_0(%arg0: i32, %arg1: i32) -> i32 {
    %c0_i32 = arith.constant 0 : i32
    %c0_i32_0 = arith.constant 0 : i32
    return %c0_i32 : i32
  }
  func.func @transform_1(%arg0: i32, %arg1: i32) -> (i32, i32, i32, i32) {
    %c0_i32 = arith.constant 0 : i32
    %c0_i32_0 = arith.constant 0 : i32
    %c0_i32_1 = arith.constant 0 : i32
    return %arg0, %arg1, %c0_i32, %c0_i32_0 : i32, i32, i32, i32
  }
  func.func @transform_2(%arg0: i32, %arg1: i32) -> (i32, i32, i32, i32) {
    %c0_i32 = arith.constant 0 : i32
    %c0_i32_0 = arith.constant 0 : i32
    %c0_i32_1 = arith.constant 0 : i32
    return %arg0, %arg1, %c0_i32, %c0_i32_0 : i32, i32, i32, i32
  }
}

</mosaic_0001>

<bundles_post_ra>
// kernel: gaussian_blur2d.1
= control target key start
LH: loop header
LB: loop body
LE: loop exit
PB: predicated region body
PF: predicated region fallthrough
CT: control target
= control target key end

     0   :  { %7 = vsyncpa [#allocation5], 0  ;;  %s1376_s0 = inlined_call_operand.vmem [shape: f32[6], index: 0, kind: input, shape index: {}]   ;;  %s1377_s1 = inlined_call_operand.hbm [shape: f32[2,4,16,16], index: 1, kind: input, shape index: {}]   ;;  %s1378_s2 = inlined_call_operand.hbm [shape: f32[2,4,16,16], index: 2, kind: output, shape index: {}]  }
   0x1   :  { %8 = vsyncpa [#allocation3], 0 }
   0x2   :  { %10 = vsyncpa [#allocation3 + $0x1], 0 }
   0x3   :  { %11 = vsyncpa [#allocation4], 0 }
   0x4   :  { %13 = vsyncpa [#allocation4 + $0x1], 0  ;;  %s993_s9 = smov 0   ;;  %s995_s10 = smov 0  }
   0x5   :  { %s997_s11 = smov 0   ;;  %s999_s12 = smov 0  }
   0x6   :  { %s1001_s13 = smov 0   ;;  %s1003_s14 = smov 0  }
   0x7 LB: > { %s736_s15 = sadd.s32 4294967295, %s967_s14   ;;  %s737_s16 = sadd.s32 4294967294, %s967_s14   ;;  %s967_s14 = sphi %s1003_s14, %s19_s14   ;;  %s963_s13 = sphi %s1001_s13, %s1390_s13   ;;  %s959_s12 = sphi %s999_s12, %s1389_s12   ;;  %s955_s11 = sphi %s997_s11, %s1388_s11   ;;  %s951_s10 = sphi %s995_s10, %s1387_s10   ;;  %s947_s9 = sphi %s993_s9, %s1386_s9  }
   0x8   : > { %s61_s17 = sadd.s32 1, %s955_s11  ;;  %p68_p0 = scmp.ne.s32.totalorder %s955_s11, %s951_s10 }
   0x9   : > { %p69_p1 = scmp.eq.s32.totalorder %s967_s14, 0  ;;  %p74_p2 = scmp.ne.s32.totalorder %s951_s10, %s947_s9 }
   0xa   : > { %p1031_p3 = scmp.eq.s32.totalorder %s736_s15, 0  ;;  %p100_p4 = scmp.eq.s32.totalorder %s736_s15, 1 }
   0xb   : > { %p1035_p5 = por %p69_p1, %p68_p0  ;;  %p106_p6 = scmp.eq.s32.totalorder %s737_s16, 1 }
   0xc   : > { %p1041_p7 = por %p1031_p3, %p74_p2  ;;  %p1045_p8 = por %p100_p4, %p68_p0 }
   0xd   : > { %p1049_p9 = por %p106_p6, %p74_p2  ;;  %p738_p10 = scmp.ge.s32.totalorder %s967_s14, 1 }
   0xe   : > { %p113_p11 = scmp.lt.s32.totalorder %s967_s14, 3  ;;  %s125_s25 = sshll.u32 %s1376_s0, 4  ;;  %s126_s25 = int_to_ptr.vmem [resolvable:$true] %s125_s25 }
   0xf   : > { %p740_p13 = scmp.ge.s32.totalorder %s967_s14, 2  ;;  %p776_p0 = scmp.lt.s32.totalorder %s967_s14, 2 }
  0x10   : > { %p1058_p12 = pnand %p738_p10, %p113_p11  ;;  %s31_s28 = sadd.s32 1, %s963_s13 }
  0x11   : > { %p1068_p2 = pnand %p776_p0, %p1035_p5  ;;  %p33_p6 = scmp.ge.s32.totalorder %s31_s28, 2 }
  0x12   : > { %p763_p1 = pneg %p1058_p12  ;;  %s136_s29 = sand.u32 1, %s955_s11  }
  0x13   : > { %s969_s30 = smov [#allocation2]   ;;  %s1392_s28 = smov (%p33_p6, %s31_s28), 0 }
  0x14   : > { %p764_p4 = pnand %p763_p1, %p1031_p3  ;;  %s741_s3 = sshll.u32 %s136_s29, 6 }
  0x15   : > { %s56_s4 = ssub.s32 %s963_s13, %s1392_s28  ;;  %s753_s5 = sshll.u32 %s963_s13, 6 }
  0x16   : > { %766 = dma.vmem_to_smem (!%p764_p4), %s126_s25, 16, %s969_s30, [#allocation5]  }
  0x17   : > { %p59_p10 = scmp.eq.s32.totalorder %s56_s4, 0  ;;  %s148_s8 = scalar_lea.hbm %s1377_s1, %s753_s5 }
  0x18   : > { %s140_s15 = scalar_lea.vmem [#allocation6], %s741_s3  ;;  %s149_s23 = sshll.u32 %s148_s8, 4  ;;  %s150_s23 = int_to_ptr.hbm [resolvable:$true] %s149_s23 }
  0x19   : > { %s151_s16 = sshll.u32 %s140_s15, 4  ;;  %s137_s24 = scalar_lea.sflag [#allocation3], %s136_s29  ;;  %s152_s16 = int_to_ptr.vmem [resolvable:$true] %s151_s16 }
  0x1a   : > { %s1087_s19 = scalar_select %p59_p10, %s955_s11, %s61_s17  }
  0x1b   : > { %s970_s25 = smov 128   ;;  %s971_s30 = smov 8  }
  0x1c   : > { %770 = dma.hbm_to_vmem [thread:$0]  (!%p1068_p2), %s150_s23, 1024, %s152_s16, %s137_s24, %s970_s25, %s970_s25, %s971_s30  }
  0x1d   : > { %163 = sbr.rel (%p1058_p12) target bundleno = 379 (0x17b), region = 28 }
  0x22   : > { %934 = dma.done.wait (%p1031_p3), [#allocation5], 16  }
  0x23   : > { %936 = vsyncadd (%p1031_p3), [#allocation5], 4294967280  ;;  %s1098_s17 = sand.u32 1, %s951_s10  }
  0x24   : > { %s746_s29 = sshll.u32 %s1098_s17, 6  ;;  %s171_s3 = scalar_lea.sflag [#allocation3], %s1098_s17 }
  0x25   : > { %s1104_s27 = scalar_lea.vmem [#allocation6], %s746_s29 }
  0x26   : > { %938 = dma.done.wait (%p1041_p7), %s171_s3, 1024  }
  0x27   : > { %940 = vsyncadd (%p1041_p7), %s171_s3, 4294966272 }
  0x28   : > { %180 = sfence }
  0x29   : > { %s199_s18 = smul.u32 3, %s959_s12  ;;  %v207_v0 = vld [vmem:[%s1104_s27 + $0x10] sm:$0xff]  ;;  %v208_v1 = vld [vmem:[%s1104_s27 + $0x18] sm:$0xff]  ;;  %vm229_vm0 = vcmask 1040384   ;;  %v205_v5 = vld [vmem:[%s1104_s27] sm:$0xff]  ;;  %vm308_vm1 = vcmask 1046528  }
  0x2a   : > { %v214_v2 = vld [vmem:[%s1104_s27 + $0x11] sm:$0x1]  ;;  %v233_v3 = vrot.slane %v207_v0, 7  ;;  %v234_v4 = vrot.slane %v208_v1, 7  ;;  %v206_v6 = vld [vmem:[%s1104_s27 + $0x8] sm:$0xff]  ;;  %v230_v8 = vrot.slane %v205_v5, 7 }
  0x2b   : > { %s1115_s20 = sld [smem:[#allocation2 + %s199_s18]]  ;;  %s201_s26 = sadd.s32 1, %s199_s18  ;;  %v213_v7 = vld [vmem:[%s1104_s27 + $0x1] sm:$0x1]  ;;  %v231_v9 = vrot.slane %v206_v6, 7  ;;  %v1123_v11 = vld [vmem:[%s1104_s27 + $0x28] sm:$0xff] }
  0x2c   : > { %s1119_s4 = sld [smem:[#allocation2 + %s201_s26]]  ;;  %s203_s5 = sadd.s32 2, %s199_s18  ;;  %v209_v10 = vld [vmem:[%s1104_s27 + $0x20] sm:$0xff]  ;;  %v1126_v12 = vld [vmem:[%s1104_s27 + $0x30] sm:$0xff]  ;;  %vm370_vm2 = vcmask 1045504   ;;  %v237_v15 = vrot.slane %v1123_v11, 7  ;;  %v235_v17 = vsel %vm229_vm0, %v233_v3, %v234_v4  ;;  %v267_v18 = vsel %vm229_vm0, %v214_v2, %v233_v3 }
  0x2d   : > { %s1128_s6 = sld [smem:[#allocation2 + %s203_s5]]  ;;  %v215_v13 = vld [vmem:[%s1104_s27 + $0x21] sm:$0x1]  ;;  %v236_v14 = vrot.slane %v209_v10, 7  ;;  %v1133_v16 = vld [vmem:[%s1104_s27 + $0x38] sm:$0xff]  ;;  %v266_v19 = vsel %vm229_vm0, %v213_v7, %v230_v8  ;;  %v232_v23 = vsel %vm229_vm0, %v230_v8, %v231_v9  ;;  %v239_v30 = vrot.slane %v1126_v12, 7 }
  0x2e   : > { %v218_v20 = vld [vmem:[%s1104_s27 + $0x1e] sm:$0x1]  ;;  %v217_v21 = vld [vmem:[%s1104_s27 + $0xe] sm:$0x1]  ;;  %v240_v31 = vrot.slane %v1133_v16, 7  ;;  %s972_s7 = smov 127  }
  0x2f   : > { %v1141_v22 = vld [vmem:[%s1104_s27 + $0x2e] sm:$0x1]  ;;  %v1147_v24 = vsel %vm229_vm0, %v236_v14, %v237_v15  ;;  %v259_v25 = vrot.slane %v218_v20, 7  ;;  %v258_v26 = vrot.slane %v217_v21, 7  ;;  %v1150_v27 = vld [vmem:[%s1104_s27 + $0x3e] sm:$0x1]  ;;  %v268_v28 = vsel %vm229_vm0, %v215_v13, %v236_v14 }
  0x30   : > { %v260_v29 = vrot.slane %v1141_v22, 7  ;;  %v261_v35 = vrot.slane %v1150_v27, 7  ;;  %s973_s8 = smov 1   ;;  %s974_s15 = smov 3   ;;  %vm496_vm3 = vcmask 138240   ;;  %vm487_vm4 = vcmask 7168  }
  0x31   : > { %v1157_v32 = vstv %s1115_s20  ;;  %v271_v33 = vsel %vm229_vm0, %v234_v4, %v259_v25  ;;  %v270_v34 = vsel %vm229_vm0, %v231_v9, %v258_v26  ;;  %s975_s16 = smov 126   ;;  %vm609_vm5 = vcmask 130048   ;;  %s1309_s23 = scalar_lea.vmem [#allocation7], %s746_s29 }
  0x32   : > { %v277_v36 = vmul.f32 %v1157_v32, %v267_v18  ;;  %v1164_v37 = vstv %s1119_s4  ;;  %v275_v38 = vmul.f32 %v1157_v32, %v266_v19  ;;  %v279_v39 = vmul.f32 %v1157_v32, %v268_v28  ;;  %s754_s24 = sshll.u32 %s959_s12, 6  ;;  %s634_s3 = sshll.u32 %s1309_s23, 4  ;;  %s635_s3 = int_to_ptr.vmem [resolvable:$true] %s634_s3 }
  0x33   : > { %v287_v40 = vmul.f32 %v1164_v37, %v267_v18  ;;  %v288_v41 = vmul.f32 %v1164_v37, %v235_v17  ;;  %v1171_v42 = vstv %s1128_s6  ;;  %v284_v43 = vmul.f32 %v1164_v37, %v266_v19  ;;  %s633_s29 = scalar_lea.hbm %s1378_s2, %s754_s24  ;;  %s619_s12 = scalar_lea.sflag [#allocation4], %s1098_s17 }
  0x34   : > { %v349_v44 = vmul.f32 %v1171_v42, %v267_v18  ;;  %v350_v45 = vmul.f32 %v1171_v42, %v235_v17  ;;  %v285_v46 = vmul.f32 %v1164_v37, %v232_v23  ;;  %v346_v47 = vmul.f32 %v1171_v42, %v266_v19  ;;  %s901_s5 = scalar_lea.hbm %s1378_s2, 128 }
  0x35   : > { %v314_v48 = vrot.slane %v287_v40, 1  ;;  %v315_v49 = vrot.slane %v288_v41, 1  ;;  %v309_v50 = vrot.slane %v284_v43, 1  ;;  %v347_v51 = vmul.f32 %v1171_v42, %v232_v23 }
  0x36   : > { %v376_v52 = vrot.slane %v349_v44, 2  ;;  %v377_v53 = vrot.slane %v350_v45, 2  ;;  %v310_v54 = vrot.slane %v285_v46, 1  ;;  %v371_v55 = vrot.slane %v346_v47, 2  ;;  %v216_v45 = vld [vmem:[%s1104_s27 + $0x31] sm:$0x1] }
  0x37   : > { %v316_v56 = vsel %vm308_vm1, %v314_v48, %v315_v49  ;;  %v372_v57 = vrot.slane %v347_v51, 2  ;;  %v290_v58 = vmul.f32 %v1164_v37, %v268_v28  ;;  %v291_v59 = vmul.f32 %v1164_v37, %v1147_v24  ;;  %s636_s27 = sshll.u32 %s633_s29, 4  ;;  %s637_s27 = int_to_ptr.hbm [resolvable:$true] %s636_s27 }
  0x38   : > { %v339_v60 = vadd.f32 %v316_v56, %v277_v36  ;;  %v378_v61 = vsel %vm370_vm2, %v376_v52, %v377_v53  ;;  %v311_v62 = vsel %vm308_vm1, %v309_v50, %v310_v54  ;;  %v352_v63 = vmul.f32 %v1171_v42, %v268_v28  ;;  %s895_s18 = sshra.s32 %s637_s27, 4  ;;  %s896_s18 = int_to_ptr.hbm [resolvable:$true] %s895_s18 }
  0x39   : > { %v337_v0 = vadd.f32 %v311_v62, %v275_v38  ;;  %v373_v1 = vsel %vm370_vm2, %v371_v55, %v372_v57  ;;  %v319_v2 = vrot.slane %v290_v58, 1  ;;  %v320_v3 = vrot.slane %v291_v59, 1  ;;  %s897_s20 = scalar_lea.hbm %s896_s18, 64  ;;  %p902_p11 = scmp.lt.s32.totalorder %s896_s18, %s1378_s2 }
  0x3a   : > { %v1187_v4 = vadd.f32 %v378_v61, %v339_v60  ;;  %v353_v5 = vmul.f32 %v1171_v42, %v1147_v24  ;;  %v381_v6 = vrot.slane %v352_v63, 2  ;;  %v278_v7 = vmul.f32 %v1157_v32, %v235_v17  ;;  %p898_p3 = scmp.ne.s32.totalorder %s896_s18, %s897_s20  ;;  %p903_p12 = scmp.lt.s32.totalorder %s901_s5, %s897_s20 }
  0x3b   : > { %v1192_v8 = vadd.f32 %v373_v1, %v337_v0  ;;  %v321_v9 = vsel %vm308_vm1, %v319_v2, %v320_v3  ;;  %v289_v10 = vmul.f32 %v1164_v37, %v271_v33  ;;  %v351_v13 = vmul.f32 %v1171_v42, %v271_v33 }
  0x3c   : > { %419 = vrot.lane.b32.xlu1 %v1187_v4, %s972_s7  ;;  %v341_v14 = vadd.f32 %v321_v9, %v279_v39  ;;  %v382_v18 = vrot.slane %v353_v5, 2  ;;  %v276_v19 = vmul.f32 %v1157_v32, %v232_v23  ;;  %v286_v20 = vmul.f32 %v1164_v37, %v270_v34  ;;  %p899_p5 = pnand %p898_p3, %p1045_p8  ;;  %p904_p0 = por %p903_p12, %p902_p11 }
  0x3d   : > { %415 = vrot.lane.b32.xlu0 %v1192_v8, %s972_s7  ;;  %v317_v17 = vrot.slane %v289_v10, 1  ;;  %v379_v21 = vrot.slane %v351_v13, 2  ;;  %v348_v22 = vmul.f32 %v1171_v42, %v270_v34  ;;  %v272_v25 = vsel %vm229_vm0, %v237_v15, %v260_v29 }
  0x3e   : > { %v383_v26 = vsel %vm370_vm2, %v381_v6, %v382_v18  ;;  %v312_v28 = vrot.slane %v286_v20, 1  ;;  %v280_v23 = vmul.f32 %v1157_v32, %v1147_v24  ;;  %v292_v33 = vmul.f32 %v1164_v37, %v272_v25  ;;  %p900_p7 = pneg %p899_p5 }
  0x3f   : > { %v403_v36 = vadd.f32 %v383_v26, %v341_v14  ;;  %v318_v38 = vsel %vm308_vm1, %v315_v49, %v317_v17  ;;  %v380_v39 = vsel %vm370_vm2, %v377_v53, %v379_v21  ;;  %v374_v40 = vrot.slane %v348_v22, 2 }
  0x40   : > { %v340_v34 = vadd.f32 %v318_v38, %v278_v7  ;;  %v313_v11 = vsel %vm308_vm1, %v310_v54, %v312_v28  ;;  %v322_v41 = vrot.slane %v292_v33, 1  ;;  %v354_v15 = vmul.f32 %v1171_v42, %v272_v25  ;;  %p905_p1 = pnand %p904_p0, %p900_p7 }
  0x41   : > { %423 = vrot.lane.b32.xlu2 %v403_v36, %s972_s7  ;;  %v338_v29 = vadd.f32 %v313_v11, %v276_v19  ;;  %v375_v43 = vsel %vm370_vm2, %v372_v57, %v374_v40  ;;  %v241_v24 = vsel %vm229_vm0, %v239_v30, %v240_v31  ;;  %v273_v44 = vsel %vm229_vm0, %v240_v31, %v261_v35 }
  0x42   : > { %v402_v46 = vadd.f32 %v380_v39, %v340_v34  ;;  %v323_v47 = vsel %vm308_vm1, %v320_v3, %v322_v41  ;;  %v384_v48 = vrot.slane %v354_v15, 2  ;;  %v282_v49 = vmul.f32 %v1157_v32, %v241_v24 }
  0x43   : > { %v400_v50 = vadd.f32 %v375_v43, %v338_v29  ;;  %v342_v51 = vadd.f32 %v323_v47, %v280_v23  ;;  %v294_v52 = vmul.f32 %v1164_v37, %v241_v24  ;;  %v295_v53 = vmul.f32 %v1164_v37, %v273_v44 }
  0x44   : > { %421 = vrot.lane.b32.xlu1 %v402_v46, %s972_s7  ;;  %v385_v27 = vsel %vm370_vm2, %v382_v18, %v384_v48  ;;  %v356_v16 = vmul.f32 %v1171_v42, %v241_v24  ;;  %v357_v31 = vmul.f32 %v1171_v42, %v273_v44  ;;  %v269_v35 = vsel %vm229_vm0, %v216_v45, %v239_v30 }
  0x45   : > { %417 = vrot.lane.b32.xlu0 %v400_v50, %s972_s7  ;;  %v404_v54 = vadd.f32 %v385_v27, %v342_v51  ;;  %v325_v55 = vrot.slane %v294_v52, 1  ;;  %v327_v56 = vrot.slane %v295_v53, 1  ;;  %v293_v59 = vmul.f32 %v1164_v37, %v269_v35 }
  0x46   : > { %v387_v57 = vrot.slane %v356_v16, 2  ;;  %v389_v58 = vrot.slane %v357_v31, 2  ;;  %v355_v60 = vmul.f32 %v1171_v42, %v269_v35  ;;  %v281_v62 = vmul.f32 %v1157_v32, %v269_v35 }
  0x47   : > { %v328_v61 = vsel %vm308_vm1, %v325_v55, %v327_v56  ;;  %v324_v0 = vrot.slane %v293_v59, 1 }
  0x48   : > { %v344_v63 = vadd.f32 %v328_v61, %v282_v49  ;;  %v390_v12 = vsel %vm370_vm2, %v387_v57, %v389_v58  ;;  %v386_v30 = vrot.slane %v355_v60, 2 }
  0x49   : > { %425 = vrot.lane.b32.xlu2 %v404_v54, %s972_s7  ;;  %v326_v2 = vsel %vm308_vm1, %v324_v0, %v325_v55 }
  0x4a   : > { %v406_v1 = vadd.f32 %v390_v12, %v344_v63  ;;  %v388_v3 = vsel %vm370_vm2, %v386_v30, %v387_v57  ;;  %v343_v5 = vadd.f32 %v326_v2, %v281_v62 }
  0x4c   : > { %429 = vrot.lane.b32.xlu1 %v406_v1, %s972_s7  ;;  %v405_v6 = vadd.f32 %v388_v3, %v343_v5 }
  0x4e   : > { %427 = vrot.lane.b32.xlu0 %v405_v6, %s972_s7 }
  0x51   : > { %439 = vrot.lane.b32.xlu2 %v1192_v8, %s973_s8 }
  0x54   : > { %443 = vrot.lane.b32.xlu1 %v1187_v4, %s973_s8 }
  0x56   : > { %441 = vrot.lane.b32.xlu0 %v400_v50, %s973_s8 }
  0x59   : > { %445 = vrot.lane.b32.xlu2 %v402_v46, %s973_s8 }
  0x5c   : > { %449 = vrot.lane.b32.xlu1 %v404_v54, %s973_s8 }
  0x5e   : > { %447 = vrot.lane.b32.xlu0 %v403_v36, %s973_s8 }
  0x61   : > { %451 = vrot.lane.b32.xlu2 %v405_v6, %s973_s8 }
  0x64   : > { %463 = vrot.lane.b32.xlu1 %v1192_v8, %s974_s15 }
  0x66   : > { %453 = vrot.lane.b32.xlu0 %v406_v1, %s973_s8 }
  0x69   : > { %465 = vrot.lane.b32.xlu2 %v400_v50, %s974_s15 }
  0x6c   : > { %469 = vrot.lane.b32.xlu1 %v402_v46, %s974_s15 }
  0x6e   : > { %467 = vrot.lane.b32.xlu0 %v1187_v4, %s974_s15 }
  0x71   : > { %471 = vrot.lane.b32.xlu2 %v403_v36, %s974_s15 }
  0x74   : > { %475 = vrot.lane.b32.xlu1 %v405_v6, %s974_s15 }
  0x76   : > { %473 = vrot.lane.b32.xlu0 %v404_v54, %s974_s15 }
  0x79   : > { %477 = vrot.lane.b32.xlu2 %v406_v1, %s974_s15 }
  0x9b   : > { %v424_v7 = vpop.permute.xlu2 %423 }
  0xa3   : > { %v426_v9 = vpop.permute.xlu2 %425 }
  0xab   : > { %v440_v10 = vpop.permute.xlu2 %439 }
  0xae   : > { %v420_v13 = vpop.permute.xlu1 %419 }
  0xaf   : > { %v416_v14 = vpop.permute.xlu0 %415 }
  0xb0   : > { %v488_v11 = vsel %vm487_vm4, %v416_v14, %v440_v10 }
  0xb3   : > { %v446_v18 = vpop.permute.xlu2 %445 }
  0xb6   : > { %v422_v19 = vpop.permute.xlu1 %421 }
  0xb7   : > { %v418_v20 = vpop.permute.xlu0 %417  ;;  %v491_v47 = vsel %vm487_vm4, %v422_v19, %v446_v18 }
  0xbb   : > { %v452_v17 = vpop.permute.xlu2 %451 }
  0xbe   : > { %v430_v21 = vpop.permute.xlu1 %429 }
  0xc0   : > { %v428_v8 = vpop.permute.xlu0 %427 }
  0xc1   : > { %v494_v31 = vsel %vm487_vm4, %v428_v8, %v452_v17 }
  0xc3   : > { %v466_v22 = vpop.permute.xlu2 %465 }
  0xc6   : > { %v444_v25 = vpop.permute.xlu1 %443 }
  0xc7   : > { %v490_v51 = vsel %vm487_vm4, %v420_v13, %v444_v25 }
  0xc8   : > { %v442_v4 = vpop.permute.xlu0 %441 }
  0xc9   : > { %v489_v26 = vsel %vm487_vm4, %v418_v20, %v442_v4 }
  0xca   : > { %v1256_v28 = vsel %vm496_vm3, %v489_v26, %v466_v22 }
  0xcb   : > { %v514_v23 = vmul.f32 %v1256_v28, %v1164_v37  ;;  %v472_v36 = vpop.permute.xlu2 %471  ;;  %v562_v61 = vmul.f32 %v1256_v28, %v1171_v42 }
  0xcd   : > { %531 = vrot.lane.b32.xlu1 %v514_v23, %s972_s7 }
  0xce   : > { %v450_v33 = vpop.permute.xlu1 %449 }
  0xcf   : > { %v493_v56 = vsel %vm487_vm4, %v426_v9, %v450_v33 }
  0xd0   : > { %v448_v38 = vpop.permute.xlu0 %447 }
  0xd1   : > { %v492_v39 = vsel %vm487_vm4, %v424_v7, %v448_v38 }
  0xd2   : > { %v1263_v40 = vsel %vm496_vm3, %v492_v39, %v472_v36 }
  0xd3   : > { %v517_v34 = vmul.f32 %v1263_v40, %v1164_v37  ;;  %v478_v29 = vpop.permute.xlu2 %477  ;;  %v565_v63 = vmul.f32 %v1263_v40, %v1171_v42 }
  0xd5   : > { %537 = vrot.lane.b32.xlu1 %v517_v34, %s972_s7  ;;  %v506_v34 = vmul.f32 %v1256_v28, %v1157_v32 }
  0xd6   : > { %v464_v41 = vpop.permute.xlu1 %463 }
  0xd7   : > { %v497_v15 = vsel %vm496_vm3, %v488_v11, %v464_v41 }
  0xd8   : > { %v513_v43 = vmul.f32 %v497_v15, %v1164_v37  ;;  %v454_v24 = vpop.permute.xlu0 %453  ;;  %v561_v62 = vmul.f32 %v497_v15, %v1171_v42  ;;  %v505_v5 = vmul.f32 %v497_v15, %v1157_v32 }
  0xd9   : > { %v495_v44 = vsel %vm487_vm4, %v430_v21, %v454_v24 }
  0xda   : > { %529 = vrot.lane.b32.xlu0 %v513_v43, %s972_s7  ;;  %v1274_v45 = vsel %vm496_vm3, %v495_v44, %v478_v29  ;;  %v509_v43 = vmul.f32 %v1263_v40, %v1157_v32 }
  0xdb   : > { %v520_v46 = vmul.f32 %v1274_v45, %v1164_v37 }
  0xdd   : > { %543 = vrot.lane.b32.xlu1 %v520_v46, %s972_s7  ;;  %v512_v46 = vmul.f32 %v1274_v45, %v1157_v32 }
  0xde   : > { %v470_v48 = vpop.permute.xlu1 %469 }
  0xdf   : > { %v500_v49 = vsel %vm496_vm3, %v491_v47, %v470_v48 }
  0xe0   : > { %v516_v50 = vmul.f32 %v500_v49, %v1164_v37  ;;  %v468_v52 = vpop.permute.xlu0 %467  ;;  %v564_v12 = vmul.f32 %v500_v49, %v1171_v42 }
  0xe1   : > { %v499_v53 = vsel %vm496_vm3, %v490_v51, %v468_v52 }
  0xe2   : > { %535 = vrot.lane.b32.xlu0 %v516_v50, %s972_s7  ;;  %v515_v27 = vmul.f32 %v499_v53, %v1164_v37  ;;  %v563_v16 = vmul.f32 %v499_v53, %v1171_v42  ;;  %v507_v18 = vmul.f32 %v499_v53, %v1157_v32 }
  0xe4   : > { %533 = vrot.lane.b32.xlu2 %v515_v27, %s972_s7 }
  0xe5   : > { %581 = vrot.lane.b32.xlu1 %v563_v16, %s975_s16 }
  0xe6   : > { %v476_v35 = vpop.permute.xlu1 %475 }
  0xe7   : > { %v503_v54 = vsel %vm496_vm3, %v494_v31, %v476_v35 }
  0xe8   : > { %v519_v55 = vmul.f32 %v503_v54, %v1164_v37  ;;  %v474_v57 = vpop.permute.xlu0 %473  ;;  %v567_v0 = vmul.f32 %v503_v54, %v1171_v42  ;;  %v511_v25 = vmul.f32 %v503_v54, %v1157_v32 }
  0xe9   : > { %v502_v58 = vsel %vm496_vm3, %v493_v56, %v474_v57 }
  0xea   : > { %541 = vrot.lane.b32.xlu0 %v519_v55, %s972_s7  ;;  %v518_v59 = vmul.f32 %v502_v58, %v1164_v37  ;;  %v566_v60 = vmul.f32 %v502_v58, %v1171_v42  ;;  %v568_v37 = vmul.f32 %v1274_v45, %v1171_v42  ;;  %v508_v42 = vmul.f32 %v500_v49, %v1157_v32 }
  0xeb   : > { %v510_v26 = vmul.f32 %v502_v58, %v1157_v32 }
  0xec   : > { %539 = vrot.lane.b32.xlu2 %v518_v59, %s972_s7 }
  0xed   : > { %587 = vrot.lane.b32.xlu1 %v566_v60, %s975_s16 }
  0xf2   : > { %579 = vrot.lane.b32.xlu0 %v562_v61, %s975_s16 }
  0xf4   : > { %577 = vrot.lane.b32.xlu2 %v561_v62, %s975_s16 }
  0xfa   : > { %585 = vrot.lane.b32.xlu0 %v565_v63, %s975_s16 }
  0xfc   : > { %583 = vrot.lane.b32.xlu2 %v564_v12, %s975_s16 }
 0x102   : > { %591 = vrot.lane.b32.xlu0 %v568_v37, %s975_s16 }
 0x104   : > { %589 = vrot.lane.b32.xlu2 %v567_v0, %s975_s16 }
 0x13e   : > { %v534_v30 = vpop.permute.xlu2 %533 }
 0x13f   : > { %v532_v1 = vpop.permute.xlu1 %531  ;;  %v555_v20 = vadd.f32 %v534_v30, %v507_v18 }
 0x140   : > { %v554_v41 = vadd.f32 %v532_v1, %v506_v34 }
 0x146   : > { %v540_v2 = vpop.permute.xlu2 %539 }
 0x147   : > { %v538_v3 = vpop.permute.xlu1 %537  ;;  %v558_v33 = vadd.f32 %v540_v2, %v510_v26 }
 0x148   : > { %v557_v24 = vadd.f32 %v538_v3, %v509_v43 }
 0x14c   : > { %v530_v6 = vpop.permute.xlu0 %529 }
 0x14d   : > { %v553_v7 = vadd.f32 %v530_v6, %v505_v5 }
 0x14e   : > { %v578_v9 = vpop.permute.xlu2 %577 }
 0x14f   : > { %v601_v10 = vadd.f32 %v578_v9, %v553_v7  ;;  %v544_v13 = vpop.permute.xlu1 %543 }
 0x150   : > { %v560_v47 = vadd.f32 %v544_v13, %v512_v46 }
 0x151   : > { %610 = vst.msk [vmem:[%s1309_s23] sm:$0xff] %vm609_vm5, %v601_v10 }
 0x154   : > { %v536_v14 = vpop.permute.xlu0 %535 }
 0x155   : > { %v556_v19 = vadd.f32 %v536_v14, %v508_v42 }
 0x156   : > { %v584_v17 = vpop.permute.xlu2 %583 }
 0x157   : > { %v604_v21 = vadd.f32 %v584_v17, %v556_v19  ;;  %v582_v8 = vpop.permute.xlu1 %581 }
 0x158   : > { %v603_v22 = vadd.f32 %v582_v8, %v555_v20 }
 0x159   : > { %613 = vst.msk [vmem:[%s1309_s23 + $0x18] sm:$0xff] %vm609_vm5, %v604_v21 }
 0x15a   : > { %612 = vst.msk [vmem:[%s1309_s23 + $0x10] sm:$0xff] %vm609_vm5, %v603_v22 }
 0x15c   : > { %v542_v4 = vpop.permute.xlu0 %541 }
 0x15d   : > { %v559_v23 = vadd.f32 %v542_v4, %v511_v25 }
 0x15e   : > { %v590_v36 = vpop.permute.xlu2 %589 }
 0x15f   : > { %v607_v38 = vadd.f32 %v590_v36, %v559_v23  ;;  %v588_v39 = vpop.permute.xlu1 %587 }
 0x160   : > { %v606_v11 = vadd.f32 %v588_v39, %v558_v33 }
 0x161   : > { %616 = vst.msk [vmem:[%s1309_s23 + $0x30] sm:$0xff] %vm609_vm5, %v607_v38 }
 0x162   : > { %615 = vst.msk [vmem:[%s1309_s23 + $0x28] sm:$0xff] %vm609_vm5, %v606_v11 }
 0x164   : > { %v580_v15 = vpop.permute.xlu0 %579 }
 0x165   : > { %v602_v29 = vadd.f32 %v580_v15, %v554_v41 }
 0x167   : > { %611 = vst.msk [vmem:[%s1309_s23 + $0x8] sm:$0xff] %vm609_vm5, %v602_v29 }
 0x16c   : > { %v586_v44 = vpop.permute.xlu0 %585 }
 0x16d   : > { %v605_v28 = vadd.f32 %v586_v44, %v557_v24 }
 0x16f   : > { %614 = vst.msk [vmem:[%s1309_s23 + $0x20] sm:$0xff] %vm609_vm5, %v605_v28 }
 0x174   : > { %v592_v48 = vpop.permute.xlu0 %591 }
 0x175   : > { %v608_v40 = vadd.f32 %v592_v48, %v560_v47 }
 0x177   : > { %617 = vst.msk [vmem:[%s1309_s23 + $0x38] sm:$0xff] %vm609_vm5, %v608_v40 }
 0x178   : > { %908 = shalt.err (!%p905_p1)
}
 0x179   : > { %s976_s17 = smov 128   ;;  %s977_s8 = smov 8  }
 0x17a   : > { %761 = dma.vmem_to_hbm [thread:$0]  (%p1045_p8), %s635_s3, 1024, %s637_s27, %s619_s12, %s976_s17, %s976_s17, %s977_s8  }
 0x17b PF: > { %s651_s15 = sand.u32 1, %s947_s9   ;;  %p772_p2 = pnand %p740_p13, %p1049_p9 }
 0x17c   : > { %s652_s16 = scalar_lea.sflag [#allocation4], %s651_s15 }
 0x17d   : > { %p773_p4 = pneg %p772_p2 }
 0x17f   : > { %942 = dma.done.wait (%p773_p4), %s652_s16, 1024  }
 0x180   : > { %944 = vsyncadd (%p773_p4), %s652_s16, 4294966272  ;;  %s19_s14 = sadd.s32 1, %s967_s14   ;;  %s1386_s9 = smov %s951_s10 }
 0x181   : > { %p16_p6 = scmp.ge.s32.totalorder %s19_s14, 4   ;;  %s1387_s10 = smov %s955_s11 }
 0x182   : > { %s1388_s11 = smov %s1087_s19  ;;  %s1389_s12 = smov %s963_s13 }
 0x183   : > { %s1390_s13 = smov %s1392_s28  ;;  %18 = sbr.rel (!%p16_p6) target bundleno = 7 (0x7), region = 78 }
 0x188   :  { %658 = vsyncpa [#allocation3], 1 }
 0x189   :  { %660 = vsyncpa [#allocation3 + $0x1], 1 }
 0x18a   :  { %661 = vsyncpa [#allocation4], 1 }
 0x18b   :  { %663 = vsyncpa [#allocation4 + $0x1], 1 }
 0x18c   :  { %664 = vsyncpa [#allocation5], 1 }
 0x18d   :  { %666 = vsyncpa [#allocation5 + $0x1], 1 }

</bundles_post_ra>
